<compile_context>
chip_gen: v6e
topology: v6e:2x2x1
jax: 0.10.0
libtpu: 0.0.40
codegen_flags: <defaults>
</compile_context>

<pallas_src>
import functools

import jax
import jax.numpy as jnp
from jax.experimental import pallas as pl
from jax.experimental.pallas import tpu as pltpu


def _iou_loss_kernel(boxes_ref, loss_ref, *, loss_type: str):
    # boxes_ref: (8, TILE_R, 128) f32; each channel is a dense (TILE_R, 128) slab.
    px = boxes_ref[0]
    py = boxes_ref[1]
    pw = boxes_ref[2]
    ph = boxes_ref[3]
    tx = boxes_ref[4]
    ty = boxes_ref[5]
    tw = boxes_ref[6]
    th = boxes_ref[7]

    # half extents / corners (hoisted, reused by the giou branch)
    p_hw = pw * 0.5
    p_hh = ph * 0.5
    t_hw = tw * 0.5
    t_hh = th * 0.5
    p_x1 = px - p_hw
    p_x2 = px + p_hw
    p_y1 = py - p_hh
    p_y2 = py + p_hh
    t_x1 = tx - t_hw
    t_x2 = tx + t_hw
    t_y1 = ty - t_hh
    t_y2 = ty + t_hh

    # intersection
    tl_x = jnp.maximum(p_x1, t_x1)
    tl_y = jnp.maximum(p_y1, t_y1)
    br_x = jnp.minimum(p_x2, t_x2)
    br_y = jnp.minimum(p_y2, t_y2)

    area_p = pw * ph
    area_g = tw * th

    inter = (br_x - tl_x) * (br_y - tl_y)
    area_i = jnp.where((tl_x < br_x) & (tl_y < br_y), inter, 0.0)
    area_u = area_p + area_g - area_i
    iou = area_i * pl.reciprocal(area_u + 1e-16, approx=False)

    if loss_type == "iou":
        loss = 1.0 - iou * iou
    elif loss_type == "giou":
        c_tl_x = jnp.minimum(p_x1, t_x1)
        c_tl_y = jnp.minimum(p_y1, t_y1)
        c_br_x = jnp.maximum(p_x2, t_x2)
        c_br_y = jnp.maximum(p_y2, t_y2)
        area_c = (c_br_x - c_tl_x) * (c_br_y - c_tl_y)
        giou = iou - (area_c - area_u) * pl.reciprocal(
            jnp.maximum(area_c, 1e-16), approx=False)
        loss = 1.0 - jnp.clip(giou, -1.0, 1.0)
    else:
        raise ValueError(f"unknown loss_type: {loss_type}")

    loss_ref[...] = loss


def iou_loss(pred, target, *, reduction: str = "none", loss_type: str = "iou",
             tile_n: int = 32768):
    """Matches IOUloss.forward: pred/target reshaped to (-1, 4)."""
    if loss_type not in ("iou", "giou"):
        raise ValueError(f"unknown loss_type: {loss_type}")
    assert pred.shape[0] == target.shape[0]
    pred = jnp.reshape(pred, (-1, 4)).astype(jnp.float32)
    target = jnp.reshape(target, (-1, 4)).astype(jnp.float32)
    n = pred.shape[0]

    # slab layout sizing: box index -> (row, lane) with 128 lanes per row
    n_rows = max(1, -(-n // 128))                     # ceil(n / 128)
    tile_r = max(1, min(tile_n // 128, n_rows))
    if n_rows > tile_r:
        # with a real grid, the block's sublane dim must be a multiple of 8
        tile_r = max(8, (tile_r // 8) * 8)
        n_rows = -(-n_rows // tile_r) * tile_r        # pad rows to tile multiple
    n_pad = n_rows * 128
    grid_n = n_rows // tile_r

    # single packed, channel-major input: (8, n_rows, 128)
    # TODO(synk): for large N this transpose+tail-pad is an extra HBM pass;
    # ideally the producer emits boxes in this channel-major slab layout.
    packed = jnp.concatenate([pred.T, target.T], axis=0)          # (8, n)
    packed = jnp.pad(packed, ((0, 0), (0, n_pad - n)))            # (8, n_pad)
    boxes = packed.reshape(8, n_rows, 128)

    kernel = functools.partial(_iou_loss_kernel, loss_type=loss_type)
    loss_slab = pl.pallas_call(
        kernel,
        out_shape=jax.ShapeDtypeStruct((n_rows, 128), jnp.float32),
        grid=(grid_n,),
        in_specs=[pl.BlockSpec((8, tile_r, 128), lambda i: (0, i, 0))],
        out_specs=pl.BlockSpec((tile_r, 128), lambda i: (i, 0)),
        compiler_params=pltpu.CompilerParams(
            dimension_semantics=("parallel",)),
        cost_estimate=pl.CostEstimate(
            flops=32 * n_pad, transcendentals=0, bytes_accessed=36 * n_pad),
    )(boxes)

    loss = loss_slab.reshape(n_pad)[:n]
    if reduction == "mean":
        loss = loss.mean()
    elif reduction == "sum":
        loss = loss.sum()
    return loss


def _iou_loss_ref(pred, target, *, reduction="none", loss_type="iou"):
    # pure-JAX reference for validation
    pred = jnp.reshape(pred, (-1, 4)).astype(jnp.float32)
    target = jnp.reshape(target, (-1, 4)).astype(jnp.float32)
    tl = jnp.maximum(pred[:, :2] - pred[:, 2:] / 2, target[:, :2] - target[:, 2:] / 2)
    br = jnp.minimum(pred[:, :2] + pred[:, 2:] / 2, target[:, :2] + target[:, 2:] / 2)
    area_p = jnp.prod(pred[:, 2:], axis=1)
    area_g = jnp.prod(target[:, 2:], axis=1)
    en = jnp.prod((tl < br).astype(tl.dtype), axis=1)
    area_i = jnp.prod(br - tl, axis=1) * en
    area_u = area_p + area_g - area_i
    iou = area_i / (area_u + 1e-16)
    if loss_type == "iou":
        loss = 1 - iou ** 2
    else:
        c_tl = jnp.minimum(pred[:, :2] - pred[:, 2:] / 2, target[:, :2] - target[:, 2:] / 2)
        c_br = jnp.maximum(pred[:, :2] + pred[:, 2:] / 2, target[:, :2] + target[:, 2:] / 2)
        area_c = jnp.prod(c_br - c_tl, axis=1)
        giou = iou - (area_c - area_u) / jnp.maximum(area_c, 1e-16)
        loss = 1 - jnp.clip(giou, -1.0, 1.0)
    if reduction == "mean":
        loss = loss.mean()
    elif reduction == "sum":
        loss = loss.sum()
    return loss


def _make_boxes(key, n_boxes):
    k1, k2 = jax.random.split(key)
    return jnp.concatenate(
        [jax.random.uniform(k1, (n_boxes, 2), minval=0.0, maxval=10.0),
         jax.random.uniform(k2, (n_boxes, 2), minval=0.5, maxval=5.0)], axis=1)


if __name__ == "__main__":
    key = jax.random.PRNGKey(0)
    kp, kt, kp2, kt2 = jax.random.split(key, 4)

    # small case, matching the module's default config
    n_boxes = 8
    pred = _make_boxes(kp, n_boxes)
    target = _make_boxes(kt, n_boxes)

    out = jax.block_until_ready(iou_loss(pred, target, reduction="none",
                                         loss_type="iou"))
    ref = _iou_loss_ref(pred, target, reduction="none", loss_type="iou")
    assert out.shape == (n_boxes,)
    assert jnp.allclose(out, ref, atol=1e-5, rtol=1e-5)

    # giou + mean reduction path
    out_g = jax.block_until_ready(
        iou_loss(pred, target, reduction="mean", loss_type="giou"))
    ref_g = _iou_loss_ref(pred, target, reduction="mean", loss_type="giou")
    assert jnp.allclose(out_g, ref_g, atol=1e-5, rtol=1e-5)

    # larger case with a small tile to exercise the tiled (multi-step) grid
    n_big = 2000
    pred2 = _make_boxes(kp2, n_big)
    target2 = _make_boxes(kt2, n_big)
    out2 = jax.block_until_ready(
        iou_loss(pred2, target2, reduction="none", loss_type="iou", tile_n=1024))
    ref2 = _iou_loss_ref(pred2, target2, reduction="none", loss_type="iou")
    assert out2.shape == (n_big,)
    assert jnp.allclose(out2, ref2, atol=1e-5, rtol=1e-5)

    print("KERNEL_OK")
</pallas_src>

<mosaic_0001>
module attributes {stable_mosaic.version = 11 : i64} {
  func.func @_iou_loss_kernel(%arg0: i32, %arg1: memref<8x1x128xf32, #tpu.memory_space<vmem>>, %arg2: memref<1x128xf32, #tpu.memory_space<vmem>>) attributes {dimension_semantics = [#tpu.dimension_semantics<parallel>], iteration_bounds = array<i64: 1>, scalar_prefetch = 0 : i64, scratch_operands = 0 : i64, tpu.core_type = #tpu.core_type<tc>, window_params = [{transform_indices = @transform_0, window_bounds = array<i64: 8, 1, 128>}, {transform_indices = @transform_1, window_bounds = array<i64: 1, 128>}]} {
    %c0 = arith.constant 0 : index
    %c0_0 = arith.constant 0 : index
    %c0_1 = arith.constant 0 : index
    %0 = vector.load %arg1[%c0, %c0_0, %c0_1] : memref<8x1x128xf32, #tpu.memory_space<vmem>>, vector<1x1x128xf32>
    %1 = vector.shape_cast %0 : vector<1x1x128xf32> to vector<1x128xf32>
    %c1 = arith.constant 1 : index
    %c0_2 = arith.constant 0 : index
    %c0_3 = arith.constant 0 : index
    %2 = vector.load %arg1[%c1, %c0_2, %c0_3] : memref<8x1x128xf32, #tpu.memory_space<vmem>>, vector<1x1x128xf32>
    %3 = vector.shape_cast %2 : vector<1x1x128xf32> to vector<1x128xf32>
    %c2 = arith.constant 2 : index
    %c0_4 = arith.constant 0 : index
    %c0_5 = arith.constant 0 : index
    %4 = vector.load %arg1[%c2, %c0_4, %c0_5] : memref<8x1x128xf32, #tpu.memory_space<vmem>>, vector<1x1x128xf32>
    %5 = vector.shape_cast %4 : vector<1x1x128xf32> to vector<1x128xf32>
    %c3 = arith.constant 3 : index
    %c0_6 = arith.constant 0 : index
    %c0_7 = arith.constant 0 : index
    %6 = vector.load %arg1[%c3, %c0_6, %c0_7] : memref<8x1x128xf32, #tpu.memory_space<vmem>>, vector<1x1x128xf32>
    %7 = vector.shape_cast %6 : vector<1x1x128xf32> to vector<1x128xf32>
    %c4 = arith.constant 4 : index
    %c0_8 = arith.constant 0 : index
    %c0_9 = arith.constant 0 : index
    %8 = vector.load %arg1[%c4, %c0_8, %c0_9] : memref<8x1x128xf32, #tpu.memory_space<vmem>>, vector<1x1x128xf32>
    %9 = vector.shape_cast %8 : vector<1x1x128xf32> to vector<1x128xf32>
    %c5 = arith.constant 5 : index
    %c0_10 = arith.constant 0 : index
    %c0_11 = arith.constant 0 : index
    %10 = vector.load %arg1[%c5, %c0_10, %c0_11] : memref<8x1x128xf32, #tpu.memory_space<vmem>>, vector<1x1x128xf32>
    %11 = vector.shape_cast %10 : vector<1x1x128xf32> to vector<1x128xf32>
    %c6 = arith.constant 6 : index
    %c0_12 = arith.constant 0 : index
    %c0_13 = arith.constant 0 : index
    %12 = vector.load %arg1[%c6, %c0_12, %c0_13] : memref<8x1x128xf32, #tpu.memory_space<vmem>>, vector<1x1x128xf32>
    %13 = vector.shape_cast %12 : vector<1x1x128xf32> to vector<1x128xf32>
    %c7 = arith.constant 7 : index
    %c0_14 = arith.constant 0 : index
    %c0_15 = arith.constant 0 : index
    %14 = vector.load %arg1[%c7, %c0_14, %c0_15] : memref<8x1x128xf32, #tpu.memory_space<vmem>>, vector<1x1x128xf32>
    %15 = vector.shape_cast %14 : vector<1x1x128xf32> to vector<1x128xf32>
    %cst = arith.constant 5.000000e-01 : f32
    %16 = vector.broadcast %cst : f32 to vector<1x128xf32>
    %17 = arith.mulf %5, %16 : vector<1x128xf32>
    %cst_16 = arith.constant 5.000000e-01 : f32
    %18 = vector.broadcast %cst_16 : f32 to vector<1x128xf32>
    %19 = arith.mulf %7, %18 : vector<1x128xf32>
    %cst_17 = arith.constant 5.000000e-01 : f32
    %20 = vector.broadcast %cst_17 : f32 to vector<1x128xf32>
    %21 = arith.mulf %13, %20 : vector<1x128xf32>
    %cst_18 = arith.constant 5.000000e-01 : f32
    %22 = vector.broadcast %cst_18 : f32 to vector<1x128xf32>
    %23 = arith.mulf %15, %22 : vector<1x128xf32>
    %24 = arith.subf %1, %17 : vector<1x128xf32>
    %25 = arith.addf %1, %17 : vector<1x128xf32>
    %26 = arith.subf %3, %19 : vector<1x128xf32>
    %27 = arith.addf %3, %19 : vector<1x128xf32>
    %28 = arith.subf %9, %21 : vector<1x128xf32>
    %29 = arith.addf %9, %21 : vector<1x128xf32>
    %30 = arith.subf %11, %23 : vector<1x128xf32>
    %31 = arith.addf %11, %23 : vector<1x128xf32>
    %32 = arith.maximumf %24, %28 : vector<1x128xf32>
    %33 = arith.maximumf %26, %30 : vector<1x128xf32>
    %34 = arith.minimumf %25, %29 : vector<1x128xf32>
    %35 = arith.minimumf %27, %31 : vector<1x128xf32>
    %36 = arith.mulf %5, %7 : vector<1x128xf32>
    %37 = arith.mulf %13, %15 : vector<1x128xf32>
    %38 = arith.subf %34, %32 : vector<1x128xf32>
    %39 = arith.subf %35, %33 : vector<1x128xf32>
    %40 = arith.mulf %38, %39 : vector<1x128xf32>
    %41 = arith.cmpf olt, %32, %34 : vector<1x128xf32>
    %42 = arith.cmpf olt, %33, %35 : vector<1x128xf32>
    %43 = arith.andi %41, %42 : vector<1x128xi1>
    %cst_19 = arith.constant 0.000000e+00 : f32
    %44 = vector.broadcast %cst_19 : f32 to vector<1x128xf32>
    %45 = arith.select %43, %40, %44 : vector<1x128xi1>, vector<1x128xf32>
    %46 = arith.addf %36, %37 : vector<1x128xf32>
    %47 = arith.subf %46, %45 : vector<1x128xf32>
    %cst_20 = arith.constant 1.000000e-16 : f32
    %48 = vector.broadcast %cst_20 : f32 to vector<1x128xf32>
    %49 = arith.addf %47, %48 : vector<1x128xf32>
    %50 = tpu.reciprocal %49 : vector<1x128xf32> -> vector<1x128xf32>
    %51 = arith.mulf %45, %50 : vector<1x128xf32>
    %52 = arith.mulf %51, %51 : vector<1x128xf32>
    %cst_21 = arith.constant 1.000000e+00 : f32
    %53 = vector.broadcast %cst_21 : f32 to vector<1x128xf32>
    %54 = arith.subf %53, %52 : vector<1x128xf32>
    %c0_22 = arith.constant 0 : index
    %c0_23 = arith.constant 0 : index
    %55 = vector.load %arg2[%c0_22, %c0_23] : memref<1x128xf32, #tpu.memory_space<vmem>>, vector<1x128xf32>
    tpu.vector_store %arg2[%c0_22, %c0_23], %54 {strides = array<i32>} : memref<1x128xf32, #tpu.memory_space<vmem>>, vector<1x128xf32>,
    return
  }
  func.func @transform_0(%arg0: i32) -> (i32, i32, i32) {
    %c0_i32 = arith.constant 0 : i32
    %c0_i32_0 = arith.constant 0 : i32
    %c0_i32_1 = arith.constant 0 : i32
    return %c0_i32, %arg0, %c0_i32_0 : i32, i32, i32
  }
  func.func @transform_1(%arg0: i32) -> (i32, i32) {
    %c0_i32 = arith.constant 0 : i32
    %c0_i32_0 = arith.constant 0 : i32
    return %arg0, %c0_i32 : i32, i32
  }
}

</mosaic_0001>

<bundles_post_ra>
// kernel: tpu_custom_call.1
= control target key start
LH: loop header
LB: loop body
LE: loop exit
PB: predicated region body
PF: predicated region fallthrough
CT: control target
= control target key end

     0   :  { %6 = vsyncpa [#allocation3], 0  ;;  %s156_s0 = inlined_call_operand.hbm [shape: f32[8,1,128], index: 0, kind: input, shape index: {}]   ;;  %s157_s1 = inlined_call_operand.hbm [shape: f32[1,128], index: 1, kind: output, shape index: {}]  }
   0x1   :  { %7 = vsyncpa [#allocation4], 0  ;;  %s136_s6 = smov [#allocation2]  }
   0x2   :  { %s13_s7 = sshll.u32 %s136_s6, 4  ;;  %s14_s7 = int_to_ptr.vmem [resolvable:$true] %s13_s7 }
   0x3   :  { %s100_s8 = scalar_lea.vmem %s14_s7, 128  ;;  %p105_p1 = scmp.lt.s32.totalorder %s14_s7, %s14_s7 }
   0x4   :  { %p101_p0 = scmp.ne.s32.totalorder %s14_s7, %s100_s8  ;;  %p106_p2 = scmp.lt.s32.totalorder %s100_s8, %s100_s8 }
   0x6   :  { %p107_p3 = por %p106_p2, %p105_p1 }
   0x8   :  { %p108_p4 = pnand %p107_p3, %p101_p0 }
   0xa   :  { %111 = shalt.err (!%p108_p4)
}
   0xb   :  { %s137_s9 = smov 16   ;;  %s138_s10 = smov 1  }
   0xc   :  { %19 = dma.hbm_to_vmem [thread:$0]  %s156_s0, 128, %s14_s7, [#allocation3], %s137_s9, %s137_s9, %s138_s10  }
   0xd   :  { %132 = dma.done.wait [#allocation3], 128  }
   0xe   :  { %133 = vsyncadd [#allocation3], 4294967168  ;;  %v23_v0 = vld [vmem:[#allocation2] sm:$0x1]  ;;  %v25_v1 = vld [vmem:[#allocation2 + $0x1] sm:$0x1] }
   0xf   :  { %v27_v2 = vld [vmem:[#allocation2 + $0x2] sm:$0x1]  ;;  %v29_v3 = vld [vmem:[#allocation2 + $0x3] sm:$0x1]  ;;  %v31_v4 = vld [vmem:[#allocation2 + $0x4] sm:$0x1] }
  0x10   :  { %v33_v5 = vld [vmem:[#allocation2 + $0x5] sm:$0x1]  ;;  %v35_v6 = vld [vmem:[#allocation2 + $0x6] sm:$0x1]  ;;  %v37_v7 = vld [vmem:[#allocation2 + $0x7] sm:$0x1]  ;;  %v54_v20 = vmul.f32 %v29_v3, %v27_v2 }
  0x11   :  { %v38_v8 = vmul.f32 0.5, %v27_v2  ;;  %v39_v9 = vmul.f32 0.5, %v29_v3  ;;  %v40_v10 = vmul.f32 0.5, %v35_v6  ;;  %v41_v11 = vmul.f32 0.5, %v37_v7  ;;  %s139_s0 = smov [#allocation5]  }
  0x12   :  { %v55_v21 = vmul.f32 %v37_v7, %v35_v6  ;;  %s77_s13 = sshll.u32 %s139_s0, 4  ;;  %s78_s13 = int_to_ptr.vmem [resolvable:$true] %s77_s13 }
  0x13   :  { %v42_v12 = vsub.f32 %v23_v0, %v38_v8  ;;  %v43_v13 = vadd.f32 %v38_v8, %v23_v0  ;;  %v44_v14 = vsub.f32 %v25_v1, %v39_v9  ;;  %v45_v15 = vadd.f32 %v39_v9, %v25_v1  ;;  %s112_s14 = scalar_lea.vmem %s78_s13, 16  ;;  %s116_s15 = scalar_lea.vmem %s78_s13, 32 }
  0x14   :  { %v46_v16 = vsub.f32 %v31_v4, %v40_v10  ;;  %v47_v17 = vadd.f32 %v40_v10, %v31_v4  ;;  %v48_v18 = vsub.f32 %v33_v5, %v41_v11  ;;  %v49_v19 = vadd.f32 %v41_v11, %v33_v5  ;;  %p113_p5 = scmp.ne.s32.totalorder %s78_s13, %s112_s14  ;;  %p117_p6 = scmp.lt.s32.totalorder %s78_s13, %s78_s13 }
  0x15   :  { %v63_v28 = vadd.f32 %v55_v21, %v54_v20  ;;  %p118_p7 = scmp.lt.s32.totalorder %s116_s15, %s112_s14 }
  0x16   :  { %v50_v22 = vmax.f32 %v42_v12, %v46_v16  ;;  %v51_v23 = vmax.f32 %v44_v14, %v48_v18  ;;  %v52_v24 = vmin.f32 %v43_v13, %v47_v17  ;;  %v53_v25 = vmin.f32 %v45_v15, %v49_v19 }
  0x17   :  { %p119_p8 = por %p118_p7, %p117_p6 }
  0x18   :  { %v56_v26 = vsub.f32 %v52_v24, %v50_v22  ;;  %v57_v27 = vsub.f32 %v53_v25, %v51_v23  ;;  %vm59_vm0 = vcmp.lt.f32.partialorder %v50_v22, %v52_v24  ;;  %vm60_vm1 = vcmp.lt.f32.partialorder %v51_v23, %v53_v25 }
  0x19   :  { %vm61_vm2 = vmand %vm59_vm0, %vm60_vm1  ;;  %p120_p9 = pnand %p119_p8, %p113_p5 }
  0x1a   :  { %v58_v29 = vmul.f32 %v57_v27, %v56_v26 }
  0x1c   :  { %v62_v30 = vsel %vm61_vm2, %v58_v29, 0.0 }
  0x1d   :  { %v64_v31 = vsub.f32 %v63_v28, %v62_v30 }
  0x1f   :  { %v65_v32 = vadd.f32 1e-16, %v64_v31 }
  0x21   :  { %90 = vrcp.f32 %v65_v32 }
  0x2e   :  { %v91_v33 = vpop.eup %90 }
  0x2f   :  { %v67_v34 = vmul.f32 %v91_v33, %v62_v30 }
  0x31   :  { %v68_v35 = vmul.f32 %v67_v34, %v67_v34 }
  0x33   :  { %v69_v36 = vsub.f32 1.0, %v68_v35 }
  0x35   :  { %70 = vst [vmem:[#allocation5] sm:$0x1] %v69_v36 }
  0x36   :  { %123 = shalt.err (!%p120_p9)
}
  0x37   :  { %80 = dma.vmem_to_hbm [thread:$0]  %s78_s13, 16, %s157_s1, [#allocation4]  }
  0x38   :  { %134 = dma.done.wait [#allocation4], 16  }
  0x39   :  { %135 = vsyncadd [#allocation4], 4294967280 }
  0x3a   :  { %84 = vsyncpa [#allocation3], 1 }
  0x3b   :  { %85 = vsyncpa [#allocation4], 1 }

</bundles_post_ra>
